<compile_context>
chip_gen: v7x
topology: tpu7x:2x2x1
jax: 0.10.0
libtpu: 0.0.40
codegen_flags: <defaults>
</compile_context>

<pallas_src>
import functools

import jax
import jax.numpy as jnp
from jax.experimental import pallas as pl
from jax.experimental.pallas import tpu as pltpu


def _ce_tile_kernel(logits_ref, tgt_ref, out_ref, acc_ref, *,
                    total_rows, tile_rows, n_inner):
    """One batch tile of the cross-entropy sum for one core partition.

    logits_ref: (TB, C) native-dtype VMEM tile
    tgt_ref:    (TB, 1) native-dtype VMEM tile (pre-gathered target logits)
    out_ref:    (1, 8, 128) f32 VMEM block -- per-core partial sum (lane-dense)
    acc_ref:    (1, 1) f32 SMEM scratch -- running per-core sum
    """
    c = pl.program_id(0)   # core partition ("parallel")
    i = pl.program_id(1)   # batch-tile step within the partition ("arbitrary")

    @pl.when(i == 0)
    def _init():
        acc_ref[0, 0] = jnp.float32(0.0)

    logits = logits_ref[...]                                  # (TB, C) native
    tb = logits.shape[0]

    # row_max / target logit stay in the native dtype (exact; bf16 VPU path on
    # v6e/v7x).  The only (TB, C) f32 chain is cast->sub->exp->row-sum, which has
    # a single consumer and fuses per-vreg (no materialized f32 copies).
    row_max = jnp.max(logits, axis=1, keepdims=True)                   # (TB, 1)
    shifted = logits.astype(jnp.float32) - row_max.astype(jnp.float32)
    sum_exp = jnp.sum(jnp.exp(shifted), axis=1, keepdims=True)         # (TB, 1)

    tgt = tgt_ref[...].astype(jnp.float32)                             # (TB, 1)
    per_example = row_max.astype(jnp.float32) + jnp.log(sum_exp) - tgt

    # Mask rows belonging to padded / clamped-duplicate tiles.  jnp.where drops
    # any NaN/Inf coming from garbage padded rows.
    t_logical = c * n_inner + i
    row_ids = (jax.lax.broadcasted_iota(jnp.int32, (tb, 1), 0)
               + t_logical * tile_rows)
    per_example = jnp.where(row_ids < total_rows, per_example, 0.0)

    acc_ref[0, 0] += jnp.sum(per_example)

    @pl.when(i == n_inner - 1)
    def _finalize():
        out_ref[...] = jnp.full(out_ref.shape, acc_ref[0, 0], dtype=jnp.float32)


def _choose_batch_tile(batch, classes, itemsize, target_bytes=4 << 20):
    """Largest batch tile keeping a single native-dtype input tile ~target_bytes."""
    per_row_bytes = max(1, classes * itemsize)
    tb = max(1, target_bytes // per_row_bytes)
    if tb >= batch:
        return batch
    # Keep the sublane dim a multiple of the native packing for this dtype
    # (8 rows for f32, 16 for bf16, 32 for int8/fp8) when the block is partial.
    min_rows = 8 * max(1, 4 // max(1, itemsize))
    tb = max(min_rows, (tb // min_rows) * min_rows)
    return int(min(tb, batch))


def cross_entropy_loss(logits, labels, *, block_rows=None):
    """logits: (B, C) float (any dtype), labels: (B,) int -> scalar f32 mean CE."""
    B, C = logits.shape
    labels = labels.astype(jnp.int32)
    # Tiny wrapper-side gather (reads B elements) removes iota/cmp/select from the
    # per-element hot path in the kernel.
    tgt = jnp.take_along_axis(logits, labels[:, None], axis=1)       # (B, 1) native

    itemsize = logits.dtype.itemsize
    tb = block_rows if block_rows is not None else _choose_batch_tile(B, C, itemsize)
    tb = int(min(tb, B))

    n_tiles = pl.cdiv(B, tb)
    n_cores = 2 if n_tiles > 1 else 1          # exploit both TCs on v7x; no-op on v5e/v6e
    n_inner = pl.cdiv(n_tiles, n_cores)
    grid = (n_cores, n_inner)

    def data_index_map(c, i):
        t = c * n_inner + i
        # Clamp out-of-range duplicate tiles (their rows are masked in-kernel).
        return (jnp.minimum(t, n_tiles - 1), 0)

    # VMEM budget: double-buffered native-dtype logits + targets, one conservative
    # (TB, C) f32 working term (in practice the fused chain keeps it near zero),
    # plus slack.  Clamp against physical VMEM when the generation is known
    # (v7x has only 64 MiB per TensorCore).
    need = (2 * tb * C * itemsize          # logits tiles (double-buffered)
            + 2 * tb * itemsize            # target tiles (double-buffered)
            + tb * C * 4                   # conservative f32 working set
            + (4 << 20))                   # slack
    try:
        cap = int(pltpu.get_tpu_info().vmem_capacity_bytes) * 6 // 10
    except Exception:
        cap = 32 << 20
    vmem_limit = int(min(max(need, 16 << 20), max(cap, 16 << 20)))

    kernel = functools.partial(_ce_tile_kernel, total_rows=B, tile_rows=tb,
                               n_inner=n_inner)

    out = pl.pallas_call(
        kernel,
        out_shape=jax.ShapeDtypeStruct((n_cores, 8, 128), jnp.float32),
        grid=grid,
        in_specs=[
            pl.BlockSpec((tb, C), data_index_map),   # logits tile (native dtype)
            pl.BlockSpec((tb, 1), data_index_map),   # pre-gathered target logits
        ],
        out_specs=pl.BlockSpec((1, 8, 128), lambda c, i: (c, 0, 0)),
        scratch_shapes=[pltpu.SMEM((1, 1), jnp.float32)],
        compiler_params=pltpu.CompilerParams(
            dimension_semantics=("parallel", "arbitrary"),
            vmem_limit_bytes=vmem_limit,
        ),
    )(logits, tgt)

    partials = out[:, 0, 0]                  # one partial sum per core partition
    return jnp.sum(partials) / jnp.float32(B)


class Loss:
    """JAX/Pallas port of the PyTorch `Loss` module (default configuration)."""

    def __init__(self, class_criterion_weight=1, decoder_weight=0,
                 certainty_weight=0, word_embdding_weight=0,
                 word_embdding_loss_param=None, vae_loss_param=None):
        assert decoder_weight == 0, "vae_loss branch not implemented"
        assert certainty_weight == 0, "certainty branch disabled at default weights"
        assert word_embdding_weight == 0, "triplet branch disabled at default weights"
        self.class_criterion_weight = class_criterion_weight
        self.decoder_weight = decoder_weight
        self.certainty_weight = certainty_weight
        self.word_embdding_weight = word_embdding_weight

    def __call__(self, pred, target, img=None):
        l1 = 0.0
        if self.class_criterion_weight != 0:
            l1 = cross_entropy_loss(pred["class_prob"], target)
        # Remaining branches (decoder / certainty / word-embedding) have weight 0.
        return self.class_criterion_weight * l1


def _reference_cross_entropy(logits, labels):
    """Pure-JAX reference for validation."""
    logits = logits.astype(jnp.float32)
    lse = jax.scipy.special.logsumexp(logits, axis=1)
    tgt = jnp.take_along_axis(logits, labels[:, None].astype(jnp.int32), axis=1)[:, 0]
    return jnp.mean(lse - tgt)


if __name__ == "__main__":
    key = jax.random.PRNGKey(0)
    loss_mod = Loss()  # default weights: only cross-entropy active

    # --- check 1: multi-tile batch grid (3 tiles of 8 rows split over 2 partitions), f32 ---
    k1, k2, key = jax.random.split(key, 3)
    B, C = 24, 160
    class_prob = jax.random.normal(k1, (B, C), dtype=jnp.float32)
    target = jax.random.randint(k2, (B,), 0, C, dtype=jnp.int32)
    got = jax.block_until_ready(
        cross_entropy_loss(class_prob, target, block_rows=8))
    ref = jax.block_until_ready(_reference_cross_entropy(class_prob, target))
    assert jnp.allclose(got, ref, rtol=1e-5, atol=1e-5), (got, ref)

    # --- check 2: partial final tile (B=13, tile=8) exercises row masking + clamping ---
    k1, k2, key = jax.random.split(key, 3)
    B, C = 13, 96
    class_prob = jax.random.normal(k1, (B, C), dtype=jnp.float32)
    target = jax.random.randint(k2, (B,), 0, C, dtype=jnp.int32)
    got = jax.block_until_ready(
        cross_entropy_loss(class_prob, target, block_rows=8))
    ref = jax.block_until_ready(_reference_cross_entropy(class_prob, target))
    assert jnp.allclose(got, ref, rtol=1e-5, atol=1e-5), (got, ref)

    # --- check 3: bf16 logits streamed at native width (no wrapper upcast) ---
    k1, k2, key = jax.random.split(key, 3)
    B, C = 16, 128
    class_prob = jax.random.normal(k1, (B, C), dtype=jnp.float32).astype(jnp.bfloat16)
    target = jax.random.randint(k2, (B,), 0, C, dtype=jnp.int32)
    pred = {"class_prob": class_prob}
    got = jax.block_until_ready(loss_mod(pred, target))
    ref = jax.block_until_ready(_reference_cross_entropy(class_prob, target))
    assert jnp.allclose(got, ref, rtol=1e-3, atol=1e-3), (got, ref)

    print("KERNEL_OK")
</pallas_src>

<mosaic_0001>
module attributes {stable_mosaic.version = 11 : i64} {
  func.func @_ce_tile_kernel(%arg0: i32, %arg1: i32, %arg2: memref<8x160xf32, #tpu.memory_space<vmem>>, %arg3: memref<8x1xf32, #tpu.memory_space<vmem>>, %arg4: memref<1x8x128xf32, #tpu.memory_space<vmem>>, %arg5: memref<1x1xf32, #tpu.memory_space<smem>>) attributes {dimension_semantics = [#tpu.dimension_semantics<parallel>, #tpu.dimension_semantics<arbitrary>], iteration_bounds = array<i64: 2, 2>, scalar_prefetch = 0 : i64, scratch_operands = 1 : i64, tpu.core_type = #tpu.core_type<tc>, window_params = [{transform_indices = @transform_0, window_bounds = array<i64: 8, 160>}, {transform_indices = @transform_1, window_bounds = array<i64: 8, 1>}, {transform_indices = @transform_2, window_bounds = array<i64: 1, 8, 128>}]} {
    %c0_i32 = arith.constant 0 : i32
    %0 = arith.cmpi eq, %arg1, %c0_i32 : i32
    %1 = arith.extui %0 : i1 to i32
    %c0_i32_0 = arith.constant 0 : i32
    %2 = arith.cmpi ne, %1, %c0_i32_0 : i32
    scf.if %2 {
      %cst_12 = arith.constant 0.000000e+00 : f32
      %c0_13 = arith.constant 0 : index
      %c0_14 = arith.constant 0 : index
      %35 = memref.load %arg5[%c0_13, %c0_14] : memref<1x1xf32, #tpu.memory_space<smem>>
      memref.store %cst_12, %arg5[%c0_13, %c0_14] : memref<1x1xf32, #tpu.memory_space<smem>>
    } else {
    }
    %c0 = arith.constant 0 : index
    %c0_1 = arith.constant 0 : index
    %3 = vector.load %arg2[%c0, %c0_1] : memref<8x160xf32, #tpu.memory_space<vmem>>, vector<8x160xf32>
    %cst = arith.constant dense<0xFF800000> : vector<8xf32>
    %4 = vector.multi_reduction <maximumf>, %3, %cst [1] : vector<8x160xf32> to vector<8xf32>
    %5 = vector.shape_cast %4 : vector<8xf32> to vector<8x1xf32>
    %6 = vector.broadcast %5 : vector<8x1xf32> to vector<8x160xf32>
    %7 = arith.subf %3, %6 : vector<8x160xf32>
    %8 = math.exp %7 : vector<8x160xf32>
    %cst_2 = arith.constant dense<0.000000e+00> : vector<8xf32>
    %9 = vector.multi_reduction <add>, %8, %cst_2 [1] : vector<8x160xf32> to vector<8xf32>
    %10 = vector.shape_cast %9 : vector<8xf32> to vector<8x1xf32>
    %c0_3 = arith.constant 0 : index
    %c0_4 = arith.constant 0 : index
    %11 = vector.load %arg3[%c0_3, %c0_4] : memref<8x1xf32, #tpu.memory_space<vmem>>, vector<8x1xf32>
    %12 = math.log %10 : vector<8x1xf32>
    %13 = arith.addf %5, %12 : vector<8x1xf32>
    %14 = arith.subf %13, %11 : vector<8x1xf32>
    %c2_i32 = arith.constant 2 : i32
    %15 = arith.muli %arg0, %c2_i32 : i32
    %16 = arith.addi %15, %arg1 : i32
    %17 = tpu.iota {dimensions = array<i32: 0>} : vector<8x1xi32>
    %c8_i32 = arith.constant 8 : i32
    %18 = arith.muli %16, %c8_i32 : i32
    %19 = vector.broadcast %18 : i32 to vector<8x1xi32>
    %20 = arith.addi %17, %19 : vector<8x1xi32>
    %c24_i32 = arith.constant 24 : i32
    %21 = vector.broadcast %c24_i32 : i32 to vector<8x1xi32>
    %22 = arith.cmpi slt, %20, %21 : vector<8x1xi32>
    %cst_5 = arith.constant 0.000000e+00 : f32
    %23 = vector.broadcast %cst_5 : f32 to vector<8x1xf32>
    %24 = arith.select %22, %14, %23 : vector<8x1xi1>, vector<8x1xf32>
    %c0_6 = arith.constant 0 : index
    %c0_7 = arith.constant 0 : index
    %25 = memref.load %arg5[%c0_6, %c0_7] : memref<1x1xf32, #tpu.memory_space<smem>>
    %26 = vector.shape_cast %24 : vector<8x1xf32> to vector<1x8x1xf32>
    %cst_8 = arith.constant dense<0.000000e+00> : vector<1xf32>
    %27 = vector.multi_reduction <add>, %26, %cst_8 [1, 2] : vector<1x8x1xf32> to vector<1xf32>
    %28 = vector.shape_cast %27 : vector<1xf32> to vector<1x1x1xf32>
    %29 = vector.extract %28[0, 0, 0] : f32 from vector<1x1x1xf32>
    %30 = arith.addf %25, %29 : f32
    %c0_9 = arith.constant 0 : index
    %c0_10 = arith.constant 0 : index
    %31 = memref.load %arg5[%c0_9, %c0_10] : memref<1x1xf32, #tpu.memory_space<smem>>
    memref.store %30, %arg5[%c0_9, %c0_10] : memref<1x1xf32, #tpu.memory_space<smem>>
    %c1_i32 = arith.constant 1 : i32
    %32 = arith.cmpi eq, %arg1, %c1_i32 : i32
    %33 = arith.extui %32 : i1 to i32
    %c0_i32_11 = arith.constant 0 : i32
    %34 = arith.cmpi ne, %33, %c0_i32_11 : i32
    scf.if %34 {
      %c0_12 = arith.constant 0 : index
      %c0_13 = arith.constant 0 : index
      %35 = memref.load %arg5[%c0_12, %c0_13] : memref<1x1xf32, #tpu.memory_space<smem>>
      %36 = vector.broadcast %35 : f32 to vector<1x8x128xf32>
      %c0_14 = arith.constant 0 : index
      %c0_15 = arith.constant 0 : index
      %c0_16 = arith.constant 0 : index
      %37 = vector.load %arg4[%c0_14, %c0_15, %c0_16] : memref<1x8x128xf32, #tpu.memory_space<vmem>>, vector<1x8x128xf32>
      tpu.vector_store %arg4[%c0_14, %c0_15, %c0_16], %36 {strides = array<i32>} : memref<1x8x128xf32, #tpu.memory_space<vmem>>, vector<1x8x128xf32>,
    } else {
    }
    return
  }
  func.func @transform_0(%arg0: i32, %arg1: i32) -> (i32, i32) {
    %c2_i32 = arith.constant 2 : i32
    %0 = arith.muli %arg0, %c2_i32 : i32
    %1 = arith.addi %0, %arg1 : i32
    %c2_i32_0 = arith.constant 2 : i32
    %2 = arith.minsi %1, %c2_i32_0 : i32
    %c0_i32 = arith.constant 0 : i32
    %c0_i32_1 = arith.constant 0 : i32
    return %2, %c0_i32 : i32, i32
  }
  func.func @transform_1(%arg0: i32, %arg1: i32) -> (i32, i32) {
    %c2_i32 = arith.constant 2 : i32
    %0 = arith.muli %arg0, %c2_i32 : i32
    %1 = arith.addi %0, %arg1 : i32
    %c2_i32_0 = arith.constant 2 : i32
    %2 = arith.minsi %1, %c2_i32_0 : i32
    %c0_i32 = arith.constant 0 : i32
    %c0_i32_1 = arith.constant 0 : i32
    return %2, %c0_i32 : i32, i32
  }
  func.func @transform_2(%arg0: i32, %arg1: i32) -> (i32, i32, i32) {
    %c0_i32 = arith.constant 0 : i32
    %c0_i32_0 = arith.constant 0 : i32
    %c0_i32_1 = arith.constant 0 : i32
    return %arg0, %c0_i32, %c0_i32_0 : i32, i32, i32
  }
}

</mosaic_0001>

<bundles_post_ra>
// kernel: tpu_custom_call.1
= control target key start
LH: loop header
LB: loop body
LE: loop exit
PB: predicated region body
PF: predicated region fallthrough
CT: control target
= control target key end

     0   :  { %7 = vsyncpa [#allocation4], 0  ;;  %s942_s0 = inlined_call_operand.hbm [shape: f32[24,160], index: 0, kind: input, shape index: {}]   ;;  %s943_s1 = inlined_call_operand.vmem [shape: f32[24,1], index: 1, kind: input, shape index: {}]   ;;  %s944_s2 = inlined_call_operand.hbm [shape: f32[2,8,128], index: 2, kind: output, shape index: {}]  }
   0x1   :  { %9 = vsyncpa [#allocation4 + $0x1], 0 }
   0x2   :  { %10 = vsyncpa [#allocation5], 0 }
   0x3   :  { %12 = vsyncpa [#allocation5 + $0x1], 0  ;;  %s714_s9 = smov 0   ;;  %s716_s10 = smov 0  }
   0x4   :  { %s718_s11 = smov 0   ;;  %s720_s12 = smov 0  }
   0x5   :  { %s722_s13 = smov 0   ;;  %s724_s14 = smov 0  }
   0x6   :  { %s726_s15 = smov 0   ;;  %s728_s16 = smov 0  }
   0x7   :  { %s730_s17 = smov 0   ;;  %s732_s18 = smov 0  }
   0x8   :  { %s734_s19 = smov 0  }
   0x9 LB: > { %s399_s20 = sadd.s32 4294967295, %s694_s19   ;;  %s400_s21 = sadd.s32 4294967294, %s694_s19   ;;  %s694_s19 = sphi %s734_s19, %s18_s19   ;;  %s690_s18 = sphi %s732_s18, %s964_s18   ;;  %s686_s17 = sphi %s730_s17, %s963_s17   ;;  %s682_s16 = sphi %s728_s16, %s962_s16   ;;  %s678_s15 = sphi %s726_s15, %s961_s15   ;;  %s674_s14 = sphi %s724_s14, %s960_s14   ;;  %s670_s13 = sphi %s722_s13, %s959_s13   ;;  %s666_s12 = sphi %s720_s12, %s958_s12   ;;  %s662_s11 = sphi %s718_s11, %s957_s11   ;;  %s658_s10 = sphi %s716_s10, %s956_s10   ;;  %s654_s9 = sphi %s714_s9, %s955_s9  }
   0xa   : > { %s27_s22 = sadd.s32 1, %s686_s17  ;;  %s30_s23 = sadd.s32 1, %s690_s18 }
   0xb   : > { %p28_p0 = scmp.ge.s32.totalorder %s27_s22, 2  ;;  %s401_s24 = sshll.u32 %s690_s18, 1 }
   0xc   : > { %s35_s25 = sadd.s32 %s686_s17, %s401_s24  ;;  %s45_s26 = sadd.s32 1, %s674_s14 }
   0xd   : > { %s966_s22 = smov (%p28_p0, %s27_s22), 0  ;;  %s968_s23 = smov (!%p28_p0, %s30_s23), %s690_s18 }
   0xe   : > { %p36_p1 = scmp.lt.s32.totalorder %s35_s25, 2  ;;  %p52_p2 = scmp.ne.s32.totalorder %s674_s14, %s670_s13 }
   0xf   : > { %p32_p3 = scmp.ge.s32.totalorder %s968_s23, 2  ;;  %p53_p4 = scmp.eq.s32.totalorder %s694_s19, 0 }
  0x10   : > { %s970_s25 = smov (!%p36_p1, %s35_s25), 2  ;;  %p58_p6 = scmp.ne.s32.totalorder %s670_s13, %s666_s12 }
  0x11   : > { %s972_s23 = smov (%p32_p3, %s968_s23), 0  ;;  %p784_p5 = por %p53_p4, %p52_p2 }
  0x12   : > { %s402_s28 = sshll.u32 %s972_s23, 1  ;;  %p59_p7 = scmp.eq.s32.totalorder %s399_s20, 0 }
  0x13   : > { %s39_s29 = sadd.s32 %s402_s28, %s966_s22  ;;  %s102_s30 = ssub.s32 %s690_s18, %s972_s23 }
  0x14   : > { %p40_p8 = scmp.lt.s32.totalorder %s39_s29, 2  ;;  %p796_p9 = por %p59_p7, %p58_p6 }
  0x15   : > { %p103_p10 = scmp.eq.s32.totalorder %s102_s30, 0  ;;  %s105_s4 = sadd.s32 1, %s662_s11 }
  0x16   : > { %s974_s29 = smov (!%p40_p8, %s39_s29), 2  ;;  %p115_p11 = scmp.ne.s32.totalorder %s662_s11, %s658_s10 }
  0x17   : > { %s802_s5 = scalar_select %p103_p10, %s662_s11, %s105_s4  }
  0x18   : > { %s42_s6 = ssub.s32 %s970_s25, %s974_s29  ;;  %p116_p13 = scmp.eq.s32.totalorder %s399_s20, 3 }
  0x19   : > { %p43_p12 = scmp.eq.s32.totalorder %s42_s6, 0  ;;  %p121_p0 = scmp.ne.s32.totalorder %s658_s10, %s654_s9 }
  0x1a   : > { %p122_p1 = scmp.eq.s32.totalorder %s400_s21, 3  ;;  %p815_p2 = por %p116_p13, %p115_p11 }
  0x1b   : > { %s813_s7 = scalar_select %p43_p12, %s674_s14, %s45_s26  }
  0x1c   : > { %s948_s8 = scalar_select %p815_p2, 1, 0 }
  0x1d   : > { %p819_p3 = por %p122_p1, %p121_p0  ;;  %p444_p4 = scmp.lt.s32.totalorder %s694_s19, 4 }
  0x1e   : > { %s142_s24 = sand.u32 1, %s674_s14   ;;  %s427_s28 = sshll.u32 %s970_s25, 8 }
  0x1f   : > { %s949_s12 = scalar_select %p819_p3, 1, 0 }
  0x20   : > { %s407_s29 = sshll.u32 %s142_s24, 4  ;;  %s828_s4 = scalar_lea.hbm %s942_s0, %s427_s28 }
  0x21   : > { %s146_s21 = scalar_lea.vmem [#allocation3], %s407_s29  ;;  %p832_p6 = pnand %p444_p4, %p784_p5 }
  0x22   : > { %s158_s26 = sshll.u32 %s146_s21, 4  ;;  %s143_s25 = scalar_lea.sflag [#allocation4], %s142_s24  ;;  %s836_s26 = int_to_ptr.vmem [resolvable:$true] %s158_s26 }
  0x23   : > { %s542_s28 = scalar_lea.hbm %s828_s4, 256  ;;  %p544_p11 = pneg %p832_p6 }
  0x24   : > { %p543_p10 = scmp.ne.s32.totalorder %s828_s4, %s542_s28  ;;  %s547_s30 = scalar_lea.hbm %s942_s0, 768 }
  0x25   : > { %p548_p5 = scmp.lt.u32.totalorder %s828_s4, %s942_s0  ;;  %p549_p0 = scmp.lt.u32.totalorder %s547_s30, %s542_s28 }
  0x26   : > { %p545_p12 = pnand %p544_p11, %p543_p10  ;;  %p551_p4 = scmp.lt.u32.totalorder %s542_s28, %s828_s4 }
  0x27   : > { %p550_p1 = por %p549_p0, %p548_p5 }
  0x28   : > { %p546_p13 = pneg %p545_p12 }
  0x29   : > { %p552_p7 = por %p551_p4, %p550_p1 }
  0x2b   : > { %p553_p8 = pnand %p552_p7, %p546_p13 }
  0x2d   : > { %556 = shalt.err (!%p553_p8)
}
  0x2e   : > { %s557_s24 = scalar_lea.vmem %s836_s26, 256  ;;  %s696_s27 = smov [#allocation3]  }
  0x2f   : > { %p558_p10 = scmp.ne.s32.totalorder %s836_s26, %s557_s24  ;;  %s562_s29 = sshll.u32 %s696_s27, 4  ;;  %s563_s29 = int_to_ptr.vmem [resolvable:$false] %s562_s29 }
  0x30   : > { %s564_s20 = scalar_lea.vmem %s563_s29, 512  ;;  %p565_p2 = scmp.lt.s32.totalorder %s836_s26, %s563_s29 }
  0x31   : > { %p560_p12 = pnand %p558_p10, %p544_p11  ;;  %p566_p5 = scmp.lt.s32.totalorder %s564_s20, %s557_s24 }
  0x33   : > { %p561_p3 = pneg %p560_p12  ;;  %p567_p0 = por %p566_p5, %p565_p2 }
  0x35   : > { %p568_p1 = pnand %p567_p0, %p561_p3 }
  0x37   : > { %571 = shalt.err (!%p568_p1)
}
  0x38   : > { %439 = dma.hbm_to_vmem [thread:$0]  (!%p832_p6), %s828_s4, 256, %s836_s26, %s143_s25  }
  0x39   : > { %p951_p7 = scmp.lt.s32.totalorder %s694_s19, 5  ;;  %p952_p8 = scmp.ge.s32.totalorder %s694_s19, 1 }
  0x3b   : > { %p179_p11 = pnand %p952_p8, %p951_p7 }
  0x3c   : > { %s184_s28 = sand.u32 (!%p179_p11), 1, %s670_s13  }
  0x3d   : > { %182 = sbr.rel (%p179_p11) target bundleno = 635 (0x27b), region = 28  ;;  %s412_s30 = sshll.u32 (!%p179_p11), %s184_s28, 4 }
  0x3e   : > { %s185_s21 = scalar_lea.sflag (!%p179_p11), [#allocation4], %s184_s28  ;;  %s188_s24 = scalar_lea.vmem (!%p179_p11), [#allocation3], %s412_s30 }
  0x44   : > { %645 = dma.done.wait (%p796_p9), %s185_s21, 256  }
  0x45   : > { %647 = vsyncadd (%p796_p9), %s185_s21, 4294967040  ;;  %vm241_vm0 = vcmask 261120   ;;  %v239_v0 = vld [vmem:[%s188_s24] sm:$0xff]  ;;  %v240_v1 = vld [vmem:[%s188_s24 + $0x8] sm:$0xff]  ;;  %s414_s3 = sshll.u32 %s682_s16, 1  ;;  %v263_v14 = vlaneseq  ;;  %vm271_vm2 = vcmask 7168  }
  0x46   : > { %v242_v2 = vsel %vm241_vm0, %v240_v1, -inf  ;;  %s222_s4 = sadd.s32 %s678_s15, %s414_s3  ;;  %s214_s28 = sand.u32 1, %s658_s10  }
  0x47   : > { %v243_v3 = vmax.f32 %v239_v0, %v242_v2  ;;  %p223_p9 = scmp.lt.s32.totalorder %s222_s4, 2  ;;  %s421_s6 = sshll.u32 %s222_s4, 3  ;;  %v264_v15 = vshrl.u32 %v263_v14, 7 }
  0x48   : > { %v266_v16 = vstv %s421_s6  ;;  %s413_s30 = sshll.u32 %s214_s28, 3  ;;  %p445_p2 = scmp.eq.s32.totalorder %s678_s15, 0 }
  0x49   : > { %244 = vmax.xlane.f32.xlu0 %v243_v3  ;;  %s224_s26 = scalar_select %p223_p9, %s222_s4, 2  ;;  %v267_v18 = vadd.s32 %v266_v16, %v264_v15 }
  0x4a   : > { %s697_s21 = smov 0.0   ;;  %p422_p3 = scmp.ne.s32.totalorder %s678_s15, 1 }
  0x4b   : > { %s976_s26 = smov (!%p223_p9, %s224_s26), 2  ;;  %vm268_vm1 = vcmp.lt.s32.totalorder %v267_v18, 24  ;;  %433 = sst [smem:[#allocation2]] (%p445_p2), %s697_s21 }
  0x4c   : > { %s418_s25 = sshll.u32 %s976_s26, 3  ;;  %s270_s24 = sld [smem:[#allocation2]] }
  0x4d   : > { %s228_s20 = scalar_lea.vmem %s943_s1, %s418_s25  ;;  %s216_s26 = scalar_lea.vmem [#allocation6], %s413_s30 }
  0x4e   : > { %v256_v20 = vld [vmem:[%s228_s20] sm:$0xff] }
  0xd6   : > { %v245_v4 = vpop.xlane.xlu0 %244 }
  0xd7   : > { %v246_v5 = vsub.f32 %v239_v0, %v245_v4  ;;  %v247_v6 = vsub.f32 %v240_v1, %v245_v4 }
  0xd9   : > { %v248_v7 = vmul.f32 1.442695, %v246_v5  ;;  %v250_v8 = vmul.f32 1.442695, %v247_v6 }
  0xdb   : > { %536 = vpow2.f32 %v248_v7 }
  0xdc   : > { %538 = vpow2.f32 %v250_v8 }
  0xe5   : > { %v537_v9 = vpop.eup %536 }
  0xe6   : > { %v539_v10 = vpop.eup %538 }
  0xe7   : > { %v252_v11 = vsel %vm241_vm0, %v539_v10, 0.0 }
  0xe8   : > { %v253_v12 = vadd.f32 %v537_v9, %v252_v11 }
  0xea   : > { %254 = vadd.xlane.f32.xlu0 %v253_v12 }
 0x177   : > { %v255_v13 = vpop.xlane.xlu0 %254 }
 0x178   : > { %540 = vlog2.f32 %v255_v13 }
 0x182   : > { %v541_v17 = vpop.eup %540 }
 0x183   : > { %v258_v19 = vmul.f32 0.6931472, %v541_v17 }
 0x185   : > { %v259_v21 = vadd.f32 %v258_v19, %v245_v4 }
 0x187   : > { %v260_v22 = vsub.f32 %v259_v21, %v256_v20 }
 0x189   : > { %v269_v23 = vsel %vm268_vm1, %v260_v22, 0.0 }
 0x18a   : > { %v272_v24 = vsel %vm271_vm2, %v269_v23, 0.0 }
 0x18b   : > { %273 = vadd.xlane.f32.xlu1 %v272_v24 }
 0x218   : > { %v274_v25 = vpop.xlane.xlu1 %273 }
 0x219   : > { %v275_v26 = vrot.slane %v274_v25, 4 }
 0x21b   : > { %v276_v27 = vadd.f32 %v275_v26, %v274_v25 }
 0x21d   : > { %v277_v28 = vrot.slane %v276_v27, 2 }
 0x21f   : > { %v278_v29 = vadd.f32 %v277_v28, %v276_v27 }
 0x221   : > { %v279_v30 = vrot.slane %v278_v29, 1 }
 0x223   : > { %v280_v31 = vadd.f32 %v279_v30, %v278_v29 }
 0x225   : > { %428 = vpush %v280_v31 }
 0x253   : > { %288 = sbr.rel (%p422_p3) target bundleno = 610 (0x262), region = 40 }
 0x256   : > { %s429_s3 = spop %428 }
 0x257   : > { %s282_s4 = sadd.f32 %s429_s3, %s270_s24 }
 0x259   : > { %284 = sst [smem:[#allocation2]] %s282_s4 }
 0x25a   : > { %s289_s6 = sld [smem:[#allocation2]] }
 0x260   : > { %v290_v32 = vstv %s289_s6 }
 0x261   : > { %291 = vst [vmem:[%s216_s26] sm:$0xff] %v290_v32 }
 0x262 PF: > { %s424_s25 = sshll.u32 %s682_s16, 7  ;;  %s306_s21 = sshll.u32 %s216_s26, 4  ;;  %s307_s21 = int_to_ptr.vmem [resolvable:$true] %s306_s21 }
 0x263   : > { %s886_s20 = scalar_lea.hbm %s944_s2, %s424_s25  ;;  %s293_s24 = scalar_lea.sflag [#allocation5], %s214_s28 }
 0x264   : > { %s572_s3 = scalar_lea.vmem %s307_s21, 128  ;;  %p953_p13 = scmp.ne.s32.totalorder %s948_s8, 0 }
 0x265   : > { %p573_p6 = scmp.ne.s32.totalorder %s307_s21, %s572_s3  ;;  %s698_s15 = smov [#allocation6]  }
 0x266   : > { %s576_s30 = sshll.u32 %s698_s15, 4  ;;  %s577_s30 = int_to_ptr.vmem [resolvable:$false] %s576_s30 }
 0x267   : > { %p574_p4 = pnand %p573_p6, %p953_p13  ;;  %s578_s4 = scalar_lea.vmem %s577_s30, 256 }
 0x268   : > { %p579_p12 = scmp.lt.s32.totalorder %s307_s21, %s577_s30  ;;  %p580_p5 = scmp.lt.s32.totalorder %s578_s4, %s572_s3 }
 0x269   : > { %p575_p10 = pneg %p574_p4 }
 0x26a   : > { %p581_p0 = por %p580_p5, %p579_p12 }
 0x26c   : > { %p582_p1 = pnand %p581_p0, %p575_p10 }
 0x26e   : > { %585 = shalt.err (!%p582_p1)
}
 0x26f   : > { %s586_s16 = scalar_lea.hbm %s886_s20, 128  ;;  %s590_s6 = scalar_lea.hbm %s944_s2, 256 }
 0x270   : > { %p587_p7 = scmp.ne.s32.totalorder %s886_s20, %s586_s16  ;;  %p591_p9 = scmp.lt.u32.totalorder %s886_s20, %s944_s2 }
 0x271   : > { %p592_p2 = scmp.lt.u32.totalorder %s590_s6, %s586_s16  ;;  %p594_p6 = scmp.lt.u32.totalorder %s586_s16, %s886_s20 }
 0x272   : > { %p588_p8 = pnand %p587_p7, %p953_p13 }
 0x273   : > { %p593_p3 = por %p592_p2, %p591_p9 }
 0x274   : > { %p589_p11 = pneg %p588_p8 }
 0x275   : > { %p595_p4 = por %p594_p6, %p593_p3 }
 0x277   : > { %p596_p10 = pnand %p595_p4, %p589_p11 }
 0x279   : > { %599 = shalt.err (!%p596_p10)
}
 0x27a   : > { %434 = dma.vmem_to_hbm [thread:$0]  (%p953_p13), %s307_s21, 128, %s886_s20, %s293_s24  }
 0x27b PF: > { %p446_p12 = scmp.ge.s32.totalorder %s694_s19, 2  ;;  %s318_s29 = sand.u32 1, %s654_s9  }
 0x27c   : > { %p954_p5 = scmp.ne.s32.totalorder %s949_s12, 0  ;;  %s319_s3 = scalar_lea.sflag [#allocation5], %s318_s29 }
 0x27e   : > { %p441_p0 = pnand %p446_p12, %p954_p5 }
 0x280   : > { %649 = dma.done.wait (!%p441_p0), %s319_s3, 128  }
 0x281   : > { %651 = vsyncadd (!%p441_p0), %s319_s3, 4294967168  ;;  %s18_s19 = sadd.s32 1, %s694_s19   ;;  %s955_s9 = smov %s658_s10 }
 0x282   : > { %p15_p1 = scmp.ge.s32.totalorder %s18_s19, 6   ;;  %s956_s10 = smov %s662_s11 }
 0x283   : > { %s957_s11 = smov %s802_s5  ;;  %s958_s12 = smov %s670_s13 }
 0x284   : > { %s959_s13 = smov %s674_s14  ;;  %s960_s14 = smov %s813_s7 }
 0x285   : > { %s961_s15 = smov %s686_s17  ;;  %s962_s16 = smov %s690_s18 }
 0x286   : > { %s963_s17 = smov %s966_s22  ;;  %s964_s18 = smov %s972_s23 }
 0x287   :  { %17 = sbr.rel (!%p15_p1) target bundleno = 9 (0x9), region = 86 }
 0x28e   :  { %324 = vsyncpa [#allocation4], 1 }
 0x28f   :  { %326 = vsyncpa [#allocation4 + $0x1], 1 }
 0x290   :  { %327 = vsyncpa [#allocation5], 1 }
 0x291   :  { %329 = vsyncpa [#allocation5 + $0x1], 1 }

</bundles_post_ra>
